<compile_context>
chip_gen: v7x
topology: tpu7x:2x2x1
jax: 0.10.0
libtpu: 0.0.40
codegen_flags: <defaults>
</compile_context>

<pallas_src>
import math
import functools

import jax
import jax.numpy as jnp
import numpy as np
from jax.experimental import pallas as pl
from jax.experimental.pallas import tpu as pltpu


_NEG_BIG = -1e30  # mask value for padded class columns (representable in bf16)


def _round_up(x, m):
    return ((x + m - 1) // m) * m


# ---------------------------------------------------------------------------
# Pre-pass 1: L2-normalize x rows once, cast to bf16 for the MXU.
# ---------------------------------------------------------------------------
def _xnorm_kernel(x_ref, xn_ref):
    x = x_ref[...].astype(jnp.float32)
    norm = jnp.sqrt(jnp.sum(x * x, axis=-1, keepdims=True))
    xn_ref[...] = (x / jnp.maximum(norm, 1e-12)).astype(xn_ref.dtype)


# ---------------------------------------------------------------------------
# Pre-pass 2: L2-normalize weight rows once; weights arrive pre-transposed as
# (D_pad, C_pad) so normalization is a sublane (axis=0) reduction and the
# output is already in [K, N] layout, stacked per C tile:
# (num_c_tiles, D_pad, TILE_C) bf16.
# ---------------------------------------------------------------------------
def _wnorm_kernel(wt_ref, wn_ref):
    w = wt_ref[...].astype(jnp.float32)                      # (D_pad, TILE_C)
    norm = jnp.sqrt(jnp.sum(w * w, axis=0, keepdims=True))
    wn_ref[0] = (w / jnp.maximum(norm, 1e-12)).astype(wn_ref.dtype)


# ---------------------------------------------------------------------------
# Main AAM-softmax kernel (one (TILE_B, TILE_C) tile per grid step).
# Grid = (B_tiles, C_tiles), dims ("parallel", "arbitrary").
# ---------------------------------------------------------------------------
def _aamsoftmax_kernel(lab_ref, xn_ref, wn_ref, loss_ref, logits_ref,
                       m_ref, l_ref, t_ref, *,
                       cos_m, sin_m, th, mm, scale, easy_margin,
                       num_c_tiles, n_valid_last, wn_resident):
    c_idx = pl.program_id(1)
    last_c = num_c_tiles - 1

    # Per-B-tile init: reset online-softmax state (running max m, running
    # sum-of-exp l, target-logit accumulator t).
    @pl.when(c_idx == 0)
    def _init():
        m_ref[...] = jnp.full(m_ref.shape, -jnp.inf, dtype=jnp.float32)
        l_ref[...] = jnp.zeros(l_ref.shape, dtype=jnp.float32)
        t_ref[...] = jnp.zeros(t_ref.shape, dtype=jnp.float32)

    # Normalized weight slab for this C tile, already in [K, N] layout.
    if wn_resident:
        wn = wn_ref[c_idx]                                   # (D_pad, TILE_C)
    else:
        wn = wn_ref[0]                                       # (D_pad, TILE_C)

    # cosine (TILE_B, TILE_C): canonical [M,K]x[K,N], bf16 operands -> f32 acc.
    cosine = jax.lax.dot_general(
        xn_ref[...], wn,
        dimension_numbers=(((1,), (0,)), ((), ())),
        preferred_element_type=jnp.float32)

    tb, tc = cosine.shape
    lab_local = lab_ref[...] - c_idx * tc                    # (TILE_B, 1)
    local_ids = jax.lax.broadcasted_iota(jnp.int32, (tb, tc), 1)
    eq = local_ids == lab_local                              # one_hot as bool

    # Margin math ONLY on the per-row target cosine (TILE_B, 1).
    tgt_cos = jnp.sum(jnp.where(eq, cosine, 0.0), axis=-1, keepdims=True)
    sine = jnp.sqrt(jnp.clip(1.0 - tgt_cos * tgt_cos, 0.0, 1.0))
    phi = tgt_cos * cos_m - sine * sin_m
    if easy_margin:
        phi = jnp.where(tgt_cos > 0, phi, tgt_cos)
    else:
        phi = jnp.where(tgt_cos - th > 0, phi, tgt_cos - mm)

    # out == (one_hot*phi + (1-one_hot)*cosine) * scale, but with the dense
    # margin math removed: patch only the target column.
    out = cosine * scale + jnp.where(eq, (phi - tgt_cos) * scale, 0.0)

    # Accumulate the target (scaled) logit without a second full-tile reduce.
    in_tile = jnp.logical_and(lab_local >= 0, lab_local < tc)
    t_ref[...] = t_ref[...] + jnp.where(in_tile, phi * scale, 0.0)

    def _update(out_tile):
        logits_ref[...] = out_tile.astype(logits_ref.dtype)  # bf16 writeback
        m_old = m_ref[...]
        m_new = jnp.maximum(m_old, jnp.max(out_tile, axis=-1, keepdims=True))
        l_ref[...] = (jnp.exp(m_old - m_new) * l_ref[...]
                      + jnp.sum(jnp.exp(out_tile - m_new), axis=-1,
                                keepdims=True))
        m_ref[...] = m_new

    if n_valid_last < tc:
        # Only the final C tile contains padded class columns: mask there,
        # all full tiles take the fast (unmasked) path.
        @pl.when(c_idx == last_c)
        def _masked():
            _update(jnp.where(local_ids < n_valid_last, out, _NEG_BIG))

        @pl.when(c_idx != last_c)
        def _plain():
            _update(out)
    else:
        _update(out)

    @pl.when(c_idx == last_c)
    def _finalize():
        loss_ref[...] = m_ref[...] + jnp.log(l_ref[...]) - t_ref[...]


# ---------------------------------------------------------------------------
# Wrapper
# ---------------------------------------------------------------------------
def aamsoftmax_forward(x, weight, label, *, margin=0.1, scale=30.0,
                       easy_margin=False, tile_b=256, tile_c=1024):
    """Returns (loss, logits): loss scalar f32, logits (B, C) f32."""
    B, D = x.shape
    C, D2 = weight.shape
    assert D == D2

    # Lane/sublane-aligned padded shapes and tiles.
    D_pad = _round_up(D, 128)
    # TILE_B: multiple of 16 (bf16 sublane packing) and aim for >=2 B tiles
    # so the "parallel" batch axis can shard across v7x's two TensorCores.
    TILE_B = min(tile_b, max(16, _round_up(pl.cdiv(B, 2), 16)))
    B_pad = _round_up(B, TILE_B)
    TILE_C = min(tile_c, _round_up(C, 128))
    C_pad = _round_up(C, TILE_C)
    num_b_tiles = B_pad // TILE_B
    num_c_tiles = C_pad // TILE_C

    xf = jnp.pad(x.astype(jnp.float32), ((0, B_pad - B), (0, D_pad - D)))
    wtf = jnp.pad(weight.astype(jnp.float32).T,
                  ((0, D_pad - D), (0, C_pad - C)))          # (D_pad, C_pad)
    lab2d = jnp.pad(label.reshape(B, 1).astype(jnp.int32),
                    ((0, B_pad - B), (0, 0)))

    # Pre-pass 1: normalized bf16 x (hoisted out of the main C loop).
    xn = pl.pallas_call(
        _xnorm_kernel,
        out_shape=jax.ShapeDtypeStruct((B_pad, D_pad), jnp.bfloat16),
        grid_spec=pltpu.PrefetchScalarGridSpec(
            num_scalar_prefetch=0, grid=(num_b_tiles,),
            in_specs=[pl.BlockSpec((TILE_B, D_pad), lambda i: (i, 0))],
            out_specs=pl.BlockSpec((TILE_B, D_pad), lambda i: (i, 0))),
        compiler_params=pltpu.CompilerParams(
            dimension_semantics=("parallel",)),
    )(xf)

    # Pre-pass 2: normalized, pre-transposed bf16 weights, stacked per C tile.
    wn = pl.pallas_call(
        _wnorm_kernel,
        out_shape=jax.ShapeDtypeStruct((num_c_tiles, D_pad, TILE_C),
                                       jnp.bfloat16),
        grid_spec=pltpu.PrefetchScalarGridSpec(
            num_scalar_prefetch=0, grid=(num_c_tiles,),
            in_specs=[pl.BlockSpec((D_pad, TILE_C), lambda i: (0, i))],
            out_specs=pl.BlockSpec((1, D_pad, TILE_C), lambda i: (i, 0, 0))),
        compiler_params=pltpu.CompilerParams(
            dimension_semantics=("parallel",)),
    )(wtf)

    # Keep the whole normalized weight resident in VMEM when it is small and
    # would otherwise be re-streamed from HBM once per B tile.
    wn_total_bytes = num_c_tiles * D_pad * TILE_C * 2
    wn_resident = (num_b_tiles > 1) and (2 * wn_total_bytes <= 20 * 1024 * 1024)
    if wn_resident:
        wn_spec = pl.BlockSpec((num_c_tiles, D_pad, TILE_C),
                               lambda b, c: (0, 0, 0))
    else:
        wn_spec = pl.BlockSpec((1, D_pad, TILE_C), lambda b, c: (c, 0, 0))

    # Real VMEM need (double-buffered blocks + scratch), with headroom,
    # capped well below the 64 MiB of a v7x TensorCore.
    wn_block_bytes = (num_c_tiles if wn_resident else 1) * D_pad * TILE_C * 2
    vmem_need = (2 * TILE_B * 128 * 4          # label blocks (lane-padded)
                 + 2 * TILE_B * D_pad * 2      # xn blocks
                 + 2 * wn_block_bytes          # wn blocks
                 + 2 * TILE_B * TILE_C * 2     # bf16 logits out blocks
                 + 2 * TILE_B * 128 * 4        # loss out blocks
                 + 3 * TILE_B * 128 * 4)       # m/l/t scratch
    vmem_limit = int(min(max(2 * vmem_need, 16 * 1024 * 1024),
                         48 * 1024 * 1024))

    kernel = functools.partial(
        _aamsoftmax_kernel,
        cos_m=math.cos(margin), sin_m=math.sin(margin),
        th=math.cos(math.pi - margin), mm=math.sin(math.pi - margin) * margin,
        scale=float(scale), easy_margin=easy_margin,
        num_c_tiles=num_c_tiles,
        n_valid_last=C - (num_c_tiles - 1) * TILE_C,
        wn_resident=wn_resident)

    cost = pl.CostEstimate(
        flops=2 * B_pad * C_pad * D_pad,
        transcendentals=B_pad * C_pad + 2 * B_pad,
        bytes_accessed=(B_pad * D_pad * 2
                        + (1 if wn_resident else num_b_tiles) * C_pad * D_pad * 2
                        + B_pad * C_pad * 2 + B_pad * 8))

    per_row_loss, logits = pl.pallas_call(
        kernel,
        out_shape=(jax.ShapeDtypeStruct((B_pad, 1), jnp.float32),
                   jax.ShapeDtypeStruct((B_pad, C_pad), jnp.bfloat16)),
        grid_spec=pltpu.PrefetchScalarGridSpec(
            num_scalar_prefetch=0,
            grid=(num_b_tiles, num_c_tiles),
            in_specs=[pl.BlockSpec((TILE_B, 1), lambda b, c: (b, 0)),
                      pl.BlockSpec((TILE_B, D_pad), lambda b, c: (b, 0)),
                      wn_spec],
            out_specs=[pl.BlockSpec((TILE_B, 1), lambda b, c: (b, 0)),
                       pl.BlockSpec((TILE_B, TILE_C), lambda b, c: (b, c))],
            scratch_shapes=[pltpu.VMEM((TILE_B, 1), jnp.float32),   # m
                            pltpu.VMEM((TILE_B, 1), jnp.float32),   # l
                            pltpu.VMEM((TILE_B, 1), jnp.float32)]), # tgt
        compiler_params=pltpu.CompilerParams(
            dimension_semantics=("parallel", "arbitrary"),
            vmem_limit_bytes=vmem_limit),
        cost_estimate=cost,
    )(lab2d, xn, wn)

    loss = jnp.sum(per_row_loss[:B, 0]) / B
    return loss, logits[:B, :C].astype(jnp.float32)


def topk_accuracy(logits, label, topk=(1, 10)):
    """Plain-JAX equivalent of the standard torch `accuracy` helper."""
    # TODO(synk): top-k ranking has no clean Pallas equivalent; done in JAX.
    maxk = max(topk)
    B = logits.shape[0]
    _, pred = jax.lax.top_k(logits, maxk)            # (B, maxk)
    correct = (pred == label.reshape(B, 1))          # (B, maxk)
    res = []
    for k in topk:
        correct_k = jnp.sum(correct[:, :k].astype(jnp.float32))
        res.append(correct_k * (100.0 / B))
    return res


# ---------------------------------------------------------------------------
# Pure-JAX reference at the same (bf16-MXU, f32-accumulate) precision.
# ---------------------------------------------------------------------------
def _reference(x, w, lab, margin, scale):
    xn = x / jnp.maximum(jnp.sqrt(jnp.sum(x * x, -1, keepdims=True)), 1e-12)
    wn = w / jnp.maximum(jnp.sqrt(jnp.sum(w * w, -1, keepdims=True)), 1e-12)
    cosine = jnp.dot(xn.astype(jnp.bfloat16), wn.astype(jnp.bfloat16).T,
                     preferred_element_type=jnp.float32)
    sine = jnp.sqrt(jnp.clip(1.0 - cosine * cosine, 0.0, 1.0))
    phi = cosine * math.cos(margin) - sine * math.sin(margin)
    th = math.cos(math.pi - margin)
    mm = math.sin(math.pi - margin) * margin
    phi = jnp.where(cosine - th > 0, phi, cosine - mm)
    one_hot = jax.nn.one_hot(lab, w.shape[0], dtype=jnp.float32)
    out = (one_hot * phi + (1.0 - one_hot) * cosine) * scale
    rmax = jnp.max(out, axis=-1)
    lse = rmax + jnp.log(jnp.sum(jnp.exp(out - rmax[:, None]), axis=-1))
    tgt = jnp.take_along_axis(out, lab[:, None], axis=-1)[:, 0]
    return jnp.mean(lse - tgt), out


if __name__ == "__main__":
    margin, scale = 0.1, 30.0
    key = jax.random.PRNGKey(0)

    # (batch, n_out, n_classes, tile_c): exercises single-tile, VMEM-resident
    # weights, and multi-C-tile online-softmax paths.
    configs = [
        (8, 32, 16, 1024),     # tiny module-consistent example (1 B, 1 C tile)
        (40, 100, 300, 1024),  # 2 B tiles -> resident wn, masked last C tile
        (24, 48, 200, 128),    # 2 B tiles x 2 C tiles (full + padded C tile)
    ]

    prec1 = None
    for ci, (batch, n_out, n_classes, tile_c) in enumerate(configs):
        key, kx, kw, kl = jax.random.split(key, 4)
        x = jax.random.normal(kx, (batch, n_out), dtype=jnp.float32)
        # xavier_normal_(weight, gain=1): std = sqrt(2 / (fan_in + fan_out))
        std = math.sqrt(2.0 / (n_classes + n_out))
        weight = (jax.random.normal(kw, (n_classes, n_out), dtype=jnp.float32)
                  * std)
        label = jax.random.randint(kl, (batch,), 0, n_classes, dtype=jnp.int32)

        loss, logits = aamsoftmax_forward(x, weight, label, margin=margin,
                                          scale=scale, easy_margin=False,
                                          tile_c=tile_c)
        jax.block_until_ready(loss)
        jax.block_until_ready(logits)

        loss_expected, logits_expected = _reference(x, weight, label,
                                                    margin, scale)
        np.testing.assert_allclose(np.asarray(loss), np.asarray(loss_expected),
                                   rtol=2e-2, atol=2e-2)
        np.testing.assert_allclose(np.asarray(logits),
                                   np.asarray(logits_expected),
                                   rtol=2e-2, atol=5e-2)

        if ci == 0:
            prec1 = topk_accuracy(logits, label, topk=(1, 10))
            jax.block_until_ready(prec1)

    print("KERNEL_OK")
</pallas_src>

<mosaic_0001>
module attributes {stable_mosaic.version = 11 : i64} {
  func.func @_xnorm_kernel(%arg0: i32, %arg1: memref<16x128xf32, #tpu.memory_space<vmem>>, %arg2: memref<16x128xbf16, #tpu.memory_space<vmem>>) attributes {dimension_semantics = [#tpu.dimension_semantics<parallel>], iteration_bounds = array<i64: 1>, scalar_prefetch = 0 : i64, scratch_operands = 0 : i64, tpu.core_type = #tpu.core_type<tc>, window_params = [{transform_indices = @transform_0, window_bounds = array<i64: 16, 128>}, {transform_indices = @transform_1, window_bounds = array<i64: 16, 128>}]} {
    %c0 = arith.constant 0 : index
    %c0_0 = arith.constant 0 : index
    %0 = vector.load %arg1[%c0, %c0_0] : memref<16x128xf32, #tpu.memory_space<vmem>>, vector<16x128xf32>
    %1 = arith.mulf %0, %0 : vector<16x128xf32>
    %cst = arith.constant dense<0.000000e+00> : vector<16xf32>
    %2 = vector.multi_reduction <add>, %1, %cst [1] : vector<16x128xf32> to vector<16xf32>
    %3 = vector.shape_cast %2 : vector<16xf32> to vector<16x1xf32>
    %4 = math.sqrt %3 : vector<16x1xf32>
    %cst_1 = arith.constant 9.99999996E-13 : f32
    %5 = vector.broadcast %cst_1 : f32 to vector<16x1xf32>
    %6 = arith.maximumf %4, %5 : vector<16x1xf32>
    %7 = vector.broadcast %6 : vector<16x1xf32> to vector<16x128xf32>
    %8 = arith.divf %0, %7 : vector<16x128xf32>
    %9 = arith.truncf %8 : vector<16x128xf32> to vector<16x128xbf16>
    %c0_2 = arith.constant 0 : index
    %c0_3 = arith.constant 0 : index
    %10 = vector.load %arg2[%c0_2, %c0_3] : memref<16x128xbf16, #tpu.memory_space<vmem>>, vector<16x128xbf16>
    tpu.vector_store %arg2[%c0_2, %c0_3], %9 {strides = array<i32>} : memref<16x128xbf16, #tpu.memory_space<vmem>>, vector<16x128xbf16>,
    return
  }
  func.func @transform_0(%arg0: i32) -> (i32, i32) {
    %c0_i32 = arith.constant 0 : i32
    %c0_i32_0 = arith.constant 0 : i32
    return %arg0, %c0_i32 : i32, i32
  }
  func.func @transform_1(%arg0: i32) -> (i32, i32) {
    %c0_i32 = arith.constant 0 : i32
    %c0_i32_0 = arith.constant 0 : i32
    return %arg0, %c0_i32 : i32, i32
  }
}

</mosaic_0001>

<bundles_post_ra>
// kernel: tpu_custom_call.1
= control target key start
LH: loop header
LB: loop body
LE: loop exit
PB: predicated region body
PF: predicated region fallthrough
CT: control target
= control target key end

     0   :  { %6 = vsyncpa [#allocation3], 0  ;;  %s189_s0 = inlined_call_operand.hbm [shape: f32[16,128], index: 0, kind: input, shape index: {}]   ;;  %s190_s1 = inlined_call_operand.hbm [shape: bf16[16,128], index: 1, kind: output, shape index: {}]  }
   0x1   :  { %7 = vsyncpa [#allocation4], 0  ;;  %s149_s6 = smov [#allocation2]   ;;  %s101_s10 = scalar_lea.hbm %s189_s0, 256 }
   0x2   :  { %s13_s7 = sshll.u32 %s149_s6, 4  ;;  %p102_p0 = scmp.ne.s32.totalorder %s189_s0, %s101_s10  ;;  %s14_s7 = int_to_ptr.vmem [resolvable:$true] %s13_s7 }
   0x3   :  { %p105_p1 = scmp.lt.u32.totalorder %s101_s10, %s189_s0 }
   0x5   :  { %p107_p2 = pnand %p105_p1, %p102_p0 }
   0x7   :  { %110 = shalt.err (!%p107_p2)
}
   0x8   :  { %s111_s15 = scalar_lea.vmem %s14_s7, 256  ;;  %p116_p4 = scmp.lt.s32.totalorder %s14_s7, %s14_s7 }
   0x9   :  { %p112_p3 = scmp.ne.s32.totalorder %s14_s7, %s111_s15  ;;  %p117_p5 = scmp.lt.s32.totalorder %s111_s15, %s111_s15 }
   0xb   :  { %p118_p6 = por %p117_p5, %p116_p4 }
   0xd   :  { %p119_p7 = pnand %p118_p6, %p112_p3 }
   0xf   :  { %122 = shalt.err (!%p119_p7)
}
  0x10   :  { %s150_s16 = smov 128   ;;  %s151_s17 = smov 8  }
  0x11   :  { %19 = dma.hbm_to_vmem [thread:$0]  %s189_s0, 256, %s14_s7, [#allocation3], %s150_s16, %s150_s16, %s151_s17  }
  0x12   :  { %145 = dma.done.wait [#allocation3], 256  }
  0x13   :  { %146 = vsyncadd [#allocation3], 4294967040  ;;  %v23_v0 = vld [vmem:[#allocation2] sm:$0xff]  ;;  %v24_v1 = vld [vmem:[#allocation2 + $0x8] sm:$0xff]  ;;  %s152_s0 = smov [#allocation5]  }
  0x14   :  { %v25_v2 = vmul.f32 %v23_v0, %v23_v0  ;;  %v26_v3 = vmul.f32 %v24_v1, %v24_v1  ;;  %s66_s20 = sshll.u32 %s152_s0, 4  ;;  %s67_s20 = int_to_ptr.vmem [resolvable:$true] %s66_s20 }
  0x15   :  { %s123_s21 = scalar_lea.vmem %s67_s20, 128  ;;  %p128_p9 = scmp.lt.s32.totalorder %s67_s20, %s67_s20 }
  0x16   :  { %27 = vadd.xlane.f32.xlu0 %v25_v2  ;;  %p124_p8 = scmp.ne.s32.totalorder %s67_s20, %s123_s21  ;;  %p129_p10 = scmp.lt.s32.totalorder %s123_s21, %s123_s21 }
  0x18   :  { %p130_p11 = por %p129_p10, %p128_p9 }
  0x1a   :  { %29 = vadd.xlane.f32.xlu0 %v26_v3  ;;  %p131_p12 = pnand %p130_p11, %p124_p8 }
  0xa3   :  { %v28_v4 = vpop.xlane.xlu0 %27 }
  0xa4   :  { %93 = vrsqrt.f32 %v28_v4  ;;  %vm33_vm0 = vcmp.eq.f32.partialorder %v28_v4, inf  ;;  %v36_v8 = vand.u32 2147483648, %v28_v4  ;;  %vm35_vm1 = vcmp.eq.f32.partialorder %v28_v4, 0.0 }
  0xa7   :  { %v30_v5 = vpop.xlane.xlu0 %29 }
  0xa8   :  { %95 = vrsqrt.f32 %v30_v5  ;;  %vm40_vm2 = vcmp.eq.f32.partialorder %v30_v5, inf  ;;  %v43_v14 = vand.u32 2147483648, %v30_v5  ;;  %vm42_vm3 = vcmp.eq.f32.partialorder %v30_v5, 0.0 }
  0xae   :  { %v94_v6 = vpop.eup %93 }
  0xaf   :  { %v32_v7 = vmul.f32 %v94_v6, %v28_v4 }
  0xb1   :  { %v34_v9 = vsel %vm33_vm0, %v28_v4, %v32_v7 }
  0xb2   :  { %v96_v10 = vpop.eup %95  ;;  %v37_v11 = vsel %vm35_vm1, %v36_v8, %v34_v9 }
  0xb3   :  { %v45_v12 = vmax.f32 %v37_v11, 1e-12  ;;  %v39_v13 = vmul.f32 %v96_v10, %v30_v5 }
  0xb5   :  { %v41_v15 = vsel %vm40_vm2, %v30_v5, %v39_v13  ;;  %97 = vrcp.f32 %v45_v12 }
  0xb6   :  { %v44_v16 = vsel %vm42_vm3, %v43_v14, %v41_v15 }
  0xb7   :  { %v46_v17 = vmax.f32 %v44_v16, 1e-12 }
  0xb9   :  { %99 = vrcp.f32 %v46_v17 }
  0xbf   :  { %v98_v18 = vpop.eup %97 }
  0xc0   :  { %v48_v20 = vmul.f32 %v98_v18, %v23_v0 }
  0xc3   :  { %v100_v19 = vpop.eup %99 }
  0xc4   :  { %v50_v21 = vmul.f32 %v100_v19, %v24_v1 }
  0xc6   :  { %v85_v22 = vpack.c.bf16 %v50_v21, %v48_v20 }
  0xc8   :  { %86 = vst [vmem:[#allocation5] sm:$0xff] %v85_v22  }
  0xc9   :  { %134 = shalt.err (!%p131_p12)
}
  0xca   :  { %s135_s24 = scalar_lea.hbm %s190_s1, 128 }
  0xcb   :  { %p136_p13 = scmp.ne.s32.totalorder %s190_s1, %s135_s24  ;;  %p139_p0 = scmp.lt.u32.totalorder %s135_s24, %s190_s1 }
  0xcd   :  { %p141_p1 = pnand %p139_p0, %p136_p13 }
  0xcf   :  { %144 = shalt.err (!%p141_p1)
}
  0xd0   :  { %s153_s29 = smov 64   ;;  %s154_s30 = smov 4  }
  0xd1   :  { %72 = dma.vmem_to_hbm [thread:$0]  %s67_s20, 128, %s190_s1, [#allocation4], %s153_s29, %s153_s29, %s154_s30  }
  0xd2   :  { %147 = dma.done.wait [#allocation4], 128  }
  0xd3   :  { %148 = vsyncadd [#allocation4], 4294967168 }
  0xd4   :  { %76 = vsyncpa [#allocation3], 1 }
  0xd5   :  { %77 = vsyncpa [#allocation4], 1 }

</bundles_post_ra>
